<compile_context>
chip_gen: v6e
topology: v6e:2x2x1
jax: 0.10.0
libtpu: 0.0.40
codegen_flags: <defaults>
</compile_context>

<pallas_src>
import jax
import jax.numpy as jnp
from jax.experimental import pallas as pl
from jax.experimental.pallas import tpu as pltpu


def _round_up(n, m):
    return ((n + m - 1) // m) * m


def _make_kernel(pack, out_dim):
    """Builds the per-tile kernel.

    pack > 1: `pack` logical rows of `out_dim` log-probs are packed into one
    lane-dense output row of pack*out_dim (== 128) columns, in row-major
    order, so `out.reshape(B, out_dim)` in the wrapper is metadata-only.
    """

    def _logp(x_ref, w1_ref, b1_ref, w2_ref, b2_ref):
        # fc1: [TB, D](bf16) @ [D, Hp](bf16) -> f32 accumulate on the MXU.
        h = jnp.dot(x_ref[...], w1_ref[...],
                    preferred_element_type=jnp.float32) + b1_ref[...]
        # _requ: relu(x) ** 2  (padded hidden columns stay exactly 0)
        h = jnp.maximum(h, 0.0)
        h = h * h
        # fc2: [TB, Hp](f32) @ [Hp, O](f32)
        logits = jnp.dot(h, w2_ref[...],
                         preferred_element_type=jnp.float32) + b2_ref[...]
        # numerically stable log_softmax along the feature axis
        m = jnp.max(logits, axis=1, keepdims=True)
        s = logits - m
        lse = jnp.log(jnp.sum(jnp.exp(s), axis=1, keepdims=True))
        return s - lse

    if pack == 1:
        def kernel(x_ref, w1_ref, b1_ref, w2_ref, b2_ref, o_ref):
            o_ref[...] = _logp(x_ref, w1_ref, b1_ref, w2_ref,
                               b2_ref).astype(o_ref.dtype)
        return kernel

    def kernel(x_ref, w1_ref, b1_ref, w2_ref, b2_ref, o_ref, logp_ref):
        # Dense compute for the whole tile, staged through a VMEM scratch so
        # the packing below is plain (f32, sublane-strided) ref reads.
        logp_ref[...] = _logp(x_ref, w1_ref, b1_ref, w2_ref,
                              b2_ref).astype(logp_ref.dtype)
        rows = o_ref.shape[0]  # = tile_rows // pack (static)
        for j in range(pack):
            # logical rows j, j+pack, j+2*pack, ...  ->  column chunk j
            chunk = logp_ref[pl.ds(j, rows, stride=pack), :]
            o_ref[:, j * out_dim:(j + 1) * out_dim] = chunk.astype(o_ref.dtype)

    return kernel


def net_forward(x, w1, b1, w2, b2, *, tile_batch=1024):
    """x: [B, D], w1: [D, H], b1: [1, H], w2: [H, O], b2: [1, O]
    -> [B, O] log-probabilities (float32)."""
    B, D = x.shape
    H = w1.shape[1]
    out_dim = w2.shape[1]

    # ---- hidden dim padded to a lane-dense multiple of 128 (exact) --------
    H_pad = _round_up(H, 128)
    if H_pad != H:
        w1 = jnp.zeros((D, H_pad), w1.dtype).at[:, :H].set(w1)
        b1 = jnp.zeros((1, H_pad), b1.dtype).at[:, :H].set(b1)
        w2 = jnp.zeros((H_pad, out_dim), w2.dtype).at[:H, :].set(w2)

    # ---- bf16 inputs for the x-traffic-dominating first matmul ------------
    x_in = x.astype(jnp.bfloat16)
    w1 = w1.astype(jnp.bfloat16)
    b1 = b1.astype(jnp.float32)
    w2 = w2.astype(jnp.float32)
    b2 = b2.astype(jnp.float32)

    # ---- output packing factor (8 rows of 16 cols -> one 128-wide row) ----
    if out_dim % 128 == 0:
        pack = 1                     # already lane dense
    elif 128 % out_dim == 0:
        pack = 128 // out_dim        # e.g. 16 -> pack 8
    else:
        pack = 1                     # odd width: narrow full-extent columns

    B_pad = _round_up(B, pack)
    if B_pad != B:
        x_in = jnp.zeros((B_pad, D), x_in.dtype).at[:B, :].set(x_in)

    out_rows = B_pad // pack
    out_cols = pack * out_dim

    # ---- batch tile: big tiles, but >= 2 grid steps for v7x megacore ------
    row_align = max(16, 8 * pack)    # keeps x (bf16) and packed-out blocks aligned
    if B_pad <= 2 * row_align:
        tb = B_pad                   # tiny batch: single full-extent tile
    else:
        tb = max(row_align,
                 (min(tile_batch, B_pad // 2) // row_align) * row_align)
    rows_per_tile = tb // pack
    grid = (pl.cdiv(B_pad, tb),)

    scratch_shapes = ([pltpu.VMEM((tb, out_dim), jnp.float32)]
                      if pack > 1 else [])

    out = pl.pallas_call(
        _make_kernel(pack, out_dim),
        out_shape=jax.ShapeDtypeStruct((out_rows, out_cols), jnp.float32),
        grid=grid,
        in_specs=[
            # x tile moves with the batch grid index (pipelined HBM->VMEM DMA)
            pl.BlockSpec((tb, D), lambda i: (i, 0)),
            # weights / biases: same block every step -> stay VMEM-resident
            pl.BlockSpec((D, H_pad), lambda i: (0, 0)),
            pl.BlockSpec((1, H_pad), lambda i: (0, 0)),
            pl.BlockSpec((H_pad, out_dim), lambda i: (0, 0)),
            pl.BlockSpec((1, out_dim), lambda i: (0, 0)),
        ],
        out_specs=pl.BlockSpec((rows_per_tile, out_cols), lambda i: (i, 0)),
        scratch_shapes=scratch_shapes,
        compiler_params=pltpu.CompilerParams(
            dimension_semantics=("parallel",),
        ),
    )(x_in, w1, b1, w2, b2)

    # Metadata-only unpack: (B_pad//pack, pack*O) row-major == (B_pad, O).
    out = out.reshape(B_pad, out_dim)
    if B_pad != B:
        out = out[:B]
    return out


def _reference(x, w1, b1, w2, b2):
    # Matches the kernel's numerics: bf16-quantized fc1 inputs, f32 everywhere else.
    xq = x.astype(jnp.bfloat16).astype(jnp.float32)
    w1q = w1.astype(jnp.bfloat16).astype(jnp.float32)
    h = jnp.dot(xq, w1q, precision=jax.lax.Precision.HIGHEST) + b1
    h = jnp.maximum(h, 0.0) ** 2
    logits = jnp.dot(h, w2, precision=jax.lax.Precision.HIGHEST) + b2
    return jax.nn.log_softmax(logits, axis=1)


if __name__ == "__main__":
    # Small shapes consistent with Net(input_dim, output_dimension, hidden)
    input_dim, hidden, output_dim = 64, 32, 16

    key = jax.random.PRNGKey(0)
    kx, k1, kb1, k2, kb2 = jax.random.split(key, 5)

    # PyTorch stores Linear weight as [out, in]; we store the transpose [in, out].
    w1 = jax.random.normal(k1, (input_dim, hidden), dtype=jnp.float32) * 0.1
    b1 = jax.random.normal(kb1, (1, hidden), dtype=jnp.float32) * 0.1
    w2 = jax.random.normal(k2, (hidden, output_dim), dtype=jnp.float32) * 0.1
    b2 = jax.random.normal(kb2, (1, output_dim), dtype=jnp.float32) * 0.1

    # 1) small batch: single tile, packed 128-wide output rows
    x_small = jax.random.normal(kx, (16, input_dim), dtype=jnp.float32)
    out_small = jax.block_until_ready(net_forward(x_small, w1, b1, w2, b2))
    ref_small = _reference(x_small, w1, b1, w2, b2)
    assert out_small.shape == (16, output_dim)
    assert bool(jnp.isfinite(out_small).all())
    assert jnp.allclose(out_small, ref_small, atol=5e-3, rtol=5e-3), \
        "mismatch vs reference (small batch)"

    # 2) multi-tile batch (>= 2 grid steps -> both v7x TCs busy) + partial tail tile
    x_big = jax.random.normal(jax.random.PRNGKey(1), (272, input_dim), dtype=jnp.float32)
    out_big = jax.block_until_ready(net_forward(x_big, w1, b1, w2, b2, tile_batch=128))
    ref_big = _reference(x_big, w1, b1, w2, b2)
    assert out_big.shape == (272, output_dim)
    assert jnp.allclose(out_big, ref_big, atol=5e-3, rtol=5e-3), \
        "mismatch vs reference (tiled batch)"

    # 3) batch not a multiple of the packing factor (exercises row padding path)
    x_odd = jax.random.normal(jax.random.PRNGKey(2), (130, input_dim), dtype=jnp.float32)
    out_odd = jax.block_until_ready(net_forward(x_odd, w1, b1, w2, b2))
    ref_odd = _reference(x_odd, w1, b1, w2, b2)
    assert out_odd.shape == (130, output_dim)
    assert jnp.allclose(out_odd, ref_odd, atol=5e-3, rtol=5e-3), \
        "mismatch vs reference (non-multiple batch)"

    print("KERNEL_OK")
</pallas_src>

<mosaic_0001>
module attributes {stable_mosaic.version = 11 : i64} {
  func.func @kernel(%arg0: i32, %arg1: memref<16x64xbf16, #tpu.memory_space<vmem>>, %arg2: memref<64x128xbf16, #tpu.memory_space<vmem>>, %arg3: memref<1x128xf32, #tpu.memory_space<vmem>>, %arg4: memref<128x16xf32, #tpu.memory_space<vmem>>, %arg5: memref<1x16xf32, #tpu.memory_space<vmem>>, %arg6: memref<2x128xf32, #tpu.memory_space<vmem>>, %arg7: memref<16x16xf32, #tpu.memory_space<vmem>>) attributes {dimension_semantics = [#tpu.dimension_semantics<parallel>], iteration_bounds = array<i64: 1>, scalar_prefetch = 0 : i64, scratch_operands = 1 : i64, tpu.core_type = #tpu.core_type<tc>, window_params = [{transform_indices = @transform_0, window_bounds = array<i64: 16, 64>}, {pipeline_mode = #tpu.pipeline_mode<synchronous>, transform_indices = @transform_1, window_bounds = array<i64: 64, 128>}, {pipeline_mode = #tpu.pipeline_mode<synchronous>, transform_indices = @transform_2, window_bounds = array<i64: 1, 128>}, {pipeline_mode = #tpu.pipeline_mode<synchronous>, transform_indices = @transform_3, window_bounds = array<i64: 128, 16>}, {pipeline_mode = #tpu.pipeline_mode<synchronous>, transform_indices = @transform_4, window_bounds = array<i64: 1, 16>}, {transform_indices = @transform_5, window_bounds = array<i64: 2, 128>}]} {
    %c0 = arith.constant 0 : index
    %c0_0 = arith.constant 0 : index
    %0 = vector.load %arg1[%c0, %c0_0] : memref<16x64xbf16, #tpu.memory_space<vmem>>, vector<16x64xbf16>
    %c0_1 = arith.constant 0 : index
    %c0_2 = arith.constant 0 : index
    %1 = vector.load %arg2[%c0_1, %c0_2] : memref<64x128xbf16, #tpu.memory_space<vmem>>, vector<64x128xbf16>
    %cst = arith.constant dense<0.000000e+00> : vector<16x128xf32>
    %2 = tpu.matmul %0, %1, %cst {dimension_numbers = #tpu.dot_dimension_numbers<[1], [0], [0], [1], [0, 0, 1, 1], [], []>} : vector<16x64xbf16>, vector<64x128xbf16>, vector<16x128xf32> -> vector<16x128xf32>
    %c0_3 = arith.constant 0 : index
    %c0_4 = arith.constant 0 : index
    %3 = vector.load %arg3[%c0_3, %c0_4] : memref<1x128xf32, #tpu.memory_space<vmem>>, vector<1x128xf32>
    %4 = vector.broadcast %3 : vector<1x128xf32> to vector<16x128xf32>
    %5 = arith.addf %2, %4 : vector<16x128xf32>
    %cst_5 = arith.constant 0.000000e+00 : f32
    %6 = vector.broadcast %cst_5 : f32 to vector<16x128xf32>
    %7 = arith.maximumf %5, %6 : vector<16x128xf32>
    %8 = arith.mulf %7, %7 : vector<16x128xf32>
    %c0_6 = arith.constant 0 : index
    %c0_7 = arith.constant 0 : index
    %9 = vector.load %arg4[%c0_6, %c0_7] : memref<128x16xf32, #tpu.memory_space<vmem>>, vector<128x16xf32>
    %cst_8 = arith.constant dense<0.000000e+00> : vector<16x16xf32>
    %10 = tpu.matmul %8, %9, %cst_8 {dimension_numbers = #tpu.dot_dimension_numbers<[1], [0], [0], [1], [0, 0, 1, 1], [], []>} : vector<16x128xf32>, vector<128x16xf32>, vector<16x16xf32> -> vector<16x16xf32>
    %c0_9 = arith.constant 0 : index
    %c0_10 = arith.constant 0 : index
    %11 = vector.load %arg5[%c0_9, %c0_10] : memref<1x16xf32, #tpu.memory_space<vmem>>, vector<1x16xf32>
    %12 = vector.broadcast %11 : vector<1x16xf32> to vector<16x16xf32>
    %13 = arith.addf %10, %12 : vector<16x16xf32>
    %cst_11 = arith.constant dense<0xFF800000> : vector<16xf32>
    %14 = vector.multi_reduction <maximumf>, %13, %cst_11 [1] : vector<16x16xf32> to vector<16xf32>
    %15 = vector.shape_cast %14 : vector<16xf32> to vector<16x1xf32>
    %16 = vector.broadcast %15 : vector<16x1xf32> to vector<16x16xf32>
    %17 = arith.subf %13, %16 : vector<16x16xf32>
    %18 = math.exp %17 : vector<16x16xf32>
    %cst_12 = arith.constant dense<0.000000e+00> : vector<16xf32>
    %19 = vector.multi_reduction <add>, %18, %cst_12 [1] : vector<16x16xf32> to vector<16xf32>
    %20 = vector.shape_cast %19 : vector<16xf32> to vector<16x1xf32>
    %21 = math.log %20 : vector<16x1xf32>
    %22 = vector.broadcast %21 : vector<16x1xf32> to vector<16x16xf32>
    %23 = arith.subf %17, %22 : vector<16x16xf32>
    %c0_13 = arith.constant 0 : index
    %c0_14 = arith.constant 0 : index
    %24 = vector.load %arg7[%c0_13, %c0_14] : memref<16x16xf32, #tpu.memory_space<vmem>>, vector<16x16xf32>
    tpu.vector_store %arg7[%c0_13, %c0_14], %23 {strides = array<i32>} : memref<16x16xf32, #tpu.memory_space<vmem>>, vector<16x16xf32>,
    %c0_15 = arith.constant 0 : index
    %c0_16 = arith.constant 0 : index
    %25 = tpu.strided_load %arg7[%c0_15, %c0_16] {strides = array<i32: 8, 1>} : memref<16x16xf32, #tpu.memory_space<vmem>>, vector<2x16xf32>
    %c0_17 = arith.constant 0 : index
    %c0_18 = arith.constant 0 : index
    %26 = vector.load %arg6[%c0_17, %c0_18] : memref<2x128xf32, #tpu.memory_space<vmem>>, vector<2x16xf32>
    tpu.vector_store %arg6[%c0_17, %c0_18], %25 {strides = array<i32>} : memref<2x128xf32, #tpu.memory_space<vmem>>, vector<2x16xf32>,
    %c1 = arith.constant 1 : index
    %c0_19 = arith.constant 0 : index
    %27 = tpu.strided_load %arg7[%c1, %c0_19] {strides = array<i32: 8, 1>} : memref<16x16xf32, #tpu.memory_space<vmem>>, vector<2x16xf32>
    %c0_20 = arith.constant 0 : index
    %c16 = arith.constant 16 : index
    %28 = vector.load %arg6[%c0_20, %c16] : memref<2x128xf32, #tpu.memory_space<vmem>>, vector<2x16xf32>
    tpu.vector_store %arg6[%c0_20, %c16], %27 {strides = array<i32>} : memref<2x128xf32, #tpu.memory_space<vmem>>, vector<2x16xf32>,
    %c2 = arith.constant 2 : index
    %c0_21 = arith.constant 0 : index
    %29 = tpu.strided_load %arg7[%c2, %c0_21] {strides = array<i32: 8, 1>} : memref<16x16xf32, #tpu.memory_space<vmem>>, vector<2x16xf32>
    %c0_22 = arith.constant 0 : index
    %c32 = arith.constant 32 : index
    %30 = vector.load %arg6[%c0_22, %c32] : memref<2x128xf32, #tpu.memory_space<vmem>>, vector<2x16xf32>
    tpu.vector_store %arg6[%c0_22, %c32], %29 {strides = array<i32>} : memref<2x128xf32, #tpu.memory_space<vmem>>, vector<2x16xf32>,
    %c3 = arith.constant 3 : index
    %c0_23 = arith.constant 0 : index
    %31 = tpu.strided_load %arg7[%c3, %c0_23] {strides = array<i32: 8, 1>} : memref<16x16xf32, #tpu.memory_space<vmem>>, vector<2x16xf32>
    %c0_24 = arith.constant 0 : index
    %c48 = arith.constant 48 : index
    %32 = vector.load %arg6[%c0_24, %c48] : memref<2x128xf32, #tpu.memory_space<vmem>>, vector<2x16xf32>
    tpu.vector_store %arg6[%c0_24, %c48], %31 {strides = array<i32>} : memref<2x128xf32, #tpu.memory_space<vmem>>, vector<2x16xf32>,
    %c4 = arith.constant 4 : index
    %c0_25 = arith.constant 0 : index
    %33 = tpu.strided_load %arg7[%c4, %c0_25] {strides = array<i32: 8, 1>} : memref<16x16xf32, #tpu.memory_space<vmem>>, vector<2x16xf32>
    %c0_26 = arith.constant 0 : index
    %c64 = arith.constant 64 : index
    %34 = vector.load %arg6[%c0_26, %c64] : memref<2x128xf32, #tpu.memory_space<vmem>>, vector<2x16xf32>
    tpu.vector_store %arg6[%c0_26, %c64], %33 {strides = array<i32>} : memref<2x128xf32, #tpu.memory_space<vmem>>, vector<2x16xf32>,
    %c5 = arith.constant 5 : index
    %c0_27 = arith.constant 0 : index
    %35 = tpu.strided_load %arg7[%c5, %c0_27] {strides = array<i32: 8, 1>} : memref<16x16xf32, #tpu.memory_space<vmem>>, vector<2x16xf32>
    %c0_28 = arith.constant 0 : index
    %c80 = arith.constant 80 : index
    %36 = vector.load %arg6[%c0_28, %c80] : memref<2x128xf32, #tpu.memory_space<vmem>>, vector<2x16xf32>
    tpu.vector_store %arg6[%c0_28, %c80], %35 {strides = array<i32>} : memref<2x128xf32, #tpu.memory_space<vmem>>, vector<2x16xf32>,
    %c6 = arith.constant 6 : index
    %c0_29 = arith.constant 0 : index
    %37 = tpu.strided_load %arg7[%c6, %c0_29] {strides = array<i32: 8, 1>} : memref<16x16xf32, #tpu.memory_space<vmem>>, vector<2x16xf32>
    %c0_30 = arith.constant 0 : index
    %c96 = arith.constant 96 : index
    %38 = vector.load %arg6[%c0_30, %c96] : memref<2x128xf32, #tpu.memory_space<vmem>>, vector<2x16xf32>
    tpu.vector_store %arg6[%c0_30, %c96], %37 {strides = array<i32>} : memref<2x128xf32, #tpu.memory_space<vmem>>, vector<2x16xf32>,
    %c7 = arith.constant 7 : index
    %c0_31 = arith.constant 0 : index
    %39 = tpu.strided_load %arg7[%c7, %c0_31] {strides = array<i32: 8, 1>} : memref<16x16xf32, #tpu.memory_space<vmem>>, vector<2x16xf32>
    %c0_32 = arith.constant 0 : index
    %c112 = arith.constant 112 : index
    %40 = vector.load %arg6[%c0_32, %c112] : memref<2x128xf32, #tpu.memory_space<vmem>>, vector<2x16xf32>
    tpu.vector_store %arg6[%c0_32, %c112], %39 {strides = array<i32>} : memref<2x128xf32, #tpu.memory_space<vmem>>, vector<2x16xf32>,
    return
  }
  func.func @transform_0(%arg0: i32) -> (i32, i32) {
    %c0_i32 = arith.constant 0 : i32
    %c0_i32_0 = arith.constant 0 : i32
    return %arg0, %c0_i32 : i32, i32
  }
  func.func @transform_1(%arg0: i32) -> (i32, i32) {
    %c0_i32 = arith.constant 0 : i32
    %c0_i32_0 = arith.constant 0 : i32
    %c0_i32_1 = arith.constant 0 : i32
    return %c0_i32, %c0_i32_0 : i32, i32
  }
  func.func @transform_2(%arg0: i32) -> (i32, i32) {
    %c0_i32 = arith.constant 0 : i32
    %c0_i32_0 = arith.constant 0 : i32
    %c0_i32_1 = arith.constant 0 : i32
    return %c0_i32, %c0_i32_0 : i32, i32
  }
  func.func @transform_3(%arg0: i32) -> (i32, i32) {
    %c0_i32 = arith.constant 0 : i32
    %c0_i32_0 = arith.constant 0 : i32
    %c0_i32_1 = arith.constant 0 : i32
    return %c0_i32, %c0_i32_0 : i32, i32
  }
  func.func @transform_4(%arg0: i32) -> (i32, i32) {
    %c0_i32 = arith.constant 0 : i32
    %c0_i32_0 = arith.constant 0 : i32
    %c0_i32_1 = arith.constant 0 : i32
    return %c0_i32, %c0_i32_0 : i32, i32
  }
  func.func @transform_5(%arg0: i32) -> (i32, i32) {
    %c0_i32 = arith.constant 0 : i32
    %c0_i32_0 = arith.constant 0 : i32
    return %arg0, %c0_i32 : i32, i32
  }
}

</mosaic_0001>

<bundles_post_ra>
// kernel: tpu_custom_call.1
= control target key start
LH: loop header
LB: loop body
LE: loop exit
PB: predicated region body
PF: predicated region fallthrough
CT: control target
= control target key end

     0   :  { %v438_v1 = vmov 0.0   ;;  %vm439_vm0 = vmmov 0   ;;  %s556_s0 = inlined_call_operand.vmem [shape: bf16[16,64], index: 0, kind: input, shape index: {}]   ;;  %s557_s1 = inlined_call_operand.vmem [shape: bf16[64,128], index: 1, kind: input, shape index: {}]   ;;  %s558_s2 = inlined_call_operand.vmem [shape: f32[1,128], index: 2, kind: input, shape index: {}]   ;;  %s559_s3 = inlined_call_operand.vmem [shape: f32[128,16], index: 3, kind: input, shape index: {}]   ;;  %s560_s4 = inlined_call_operand.vmem [shape: f32[1,16], index: 4, kind: input, shape index: {}]   ;;  %s561_s5 = inlined_call_operand.hbm [shape: f32[2,128], index: 5, kind: output, shape index: {}]  }
   0x1   :  { %v403_v0 = vld [vmem:[%s557_s1 + $0x18] sm:$0xff]   ;;  %346 = vmatprep.subr.bf16.mxu0 %v438_v1  ;;  %v404_v2 = vld [vmem:[%s557_s1 + $0x10] sm:$0xff]   ;;  %354 = vmatprep.mubr.msk.bf16.mxu0 %vm439_vm0, %v438_v1  ;;  %v405_v5 = vld [vmem:[%s557_s1 + $0x8] sm:$0xff]  }
   0x2   :  { %347 = vmatpush3.bf16.msra.mxu0 %v403_v0  ;;  %v132_v3 = vld [vmem:[%s559_s3 + $0x78] sm:$0xff]  ;;  %v131_v4 = vld [vmem:[%s559_s3 + $0x70] sm:$0xff]  ;;  %v130_v6 = vld [vmem:[%s559_s3 + $0x68] sm:$0xff] }
   0x3   :  { %348 = vmatprep.subr.bf16.mxu0 %v438_v1  ;;  %358 = vmatprep.subr.mxu1 %v132_v3  ;;  %v129_v7 = vld [vmem:[%s559_s3 + $0x60] sm:$0xff] }
   0x4   :  { %359 = vmatpush3.msra.mxu1 %v132_v3 }
   0x5   :  { %360 = vmatprep.subr.mxu1 %v131_v4 }
   0x6   :  { %349 = vmatpush3.bf16.msra.mxu0 %v404_v2  ;;  %361 = vmatpush3.msra.mxu1 %v131_v4 }
   0x7   :  { %350 = vmatprep.subr.bf16.mxu0 %v438_v1 }
   0x8   :  { %10 = vsyncpa [#allocation4], 0  ;;  %v406_v8 = vld [vmem:[%s557_s1] sm:$0xff]   ;;  %362 = vmatprep.subr.mxu1 %v130_v6  ;;  %v128_v9 = vld [vmem:[%s559_s3 + $0x58] sm:$0xff]  ;;  %vm68_vm1 = vcmask 523264   ;;  %vm215_vm2 = vcmask 130048  }
   0x9   :  { %363 = vmatpush3.msra.mxu1 %v130_v6  ;;  %v407_v10 = vld [vmem:[%s556_s0] sm:$0xff]   ;;  %v127_v11 = vld [vmem:[%s559_s3 + $0x50] sm:$0xff]  ;;  %v126_v12 = vld [vmem:[%s559_s3 + $0x48] sm:$0xff]  ;;  %vm243_vm3 = vcmask 123904   ;;  %s442_s11 = smov 48   ;;  %s443_s12 = smov 80  }
   0xa   :  { %351 = vmatpush3.bf16.msra.mxu0 %v405_v5  ;;  %364 = vmatprep.subr.mxu1 %v129_v7  ;;  %v125_v13 = vld [vmem:[%s559_s3 + $0x40] sm:$0xff]  ;;  %v124_v14 = vld [vmem:[%s559_s3 + $0x38] sm:$0xff]  ;;  %v123_v15 = vld [vmem:[%s559_s3 + $0x30] sm:$0xff]  ;;  %s444_s13 = smov 64   ;;  %s445_s14 = smov 112   ;;  %vm251_vm4 = vcmask 255104  }
   0xb   :  { %352 = vmatprep.subr.bf16.mxu0 %v438_v1  ;;  %365 = vmatpush3.msra.mxu1 %v129_v7  ;;  %v122_v16 = vld [vmem:[%s559_s3 + $0x28] sm:$0xff]  ;;  %v121_v17 = vld [vmem:[%s559_s3 + $0x20] sm:$0xff]  ;;  %v120_v18 = vld [vmem:[%s559_s3 + $0x18] sm:$0xff]  ;;  %s446_s1 = smov 96   ;;  %vm259_vm5 = vcmask 386304   ;;  %vm267_vm6 = vcmask 517504  }
   0xc   :  { %366 = vmatprep.subr.mxu1 %v128_v9  ;;  %v119_v19 = vld [vmem:[%s559_s3 + $0x10] sm:$0xff]  ;;  %v118_v20 = vld [vmem:[%s559_s3 + $0x8] sm:$0xff]  ;;  %v117_v21 = vld [vmem:[%s559_s3] sm:$0xff]  ;;  %vm275_vm7 = vcmask 648704   ;;  %vm283_vm8 = vcmask 779904   ;;  %s447_s15 = smov [#allocation3]  }
   0xd   :  { %367 = vmatpush3.msra.mxu1 %v128_v9  ;;  %v315_v22 = vld [vmem:[%s558_s2] ss:$0 sm:$0xff]  ;;  %s440_s2 = smov 32   ;;  %s307_s16 = sshll.u32 %s447_s15, 4  ;;  %vm291_vm9 = vcmask 911104   ;;  %vm299_vm10 = vcmask 1042304   ;;  %s308_s16 = int_to_ptr.vmem [resolvable:$true] %s307_s16 }
   0xe   :  { %353 = vmatpush3.bf16.msra.mxu0 %v406_v8  ;;  %368 = vmatprep.subr.mxu1 %v127_v11  ;;  %v322_v34 = vld [vmem:[%s560_s4] ss:$0 sm:$0xff]  ;;  %s441_s4 = smov 16   ;;  %s416_s17 = scalar_lea.vmem %s308_s16, 32 }
   0xf   :  { %369 = vmatpush3.msra.mxu1 %v127_v11  ;;  %p417_p0 = scmp.ne.s32.totalorder %s308_s16, %s416_s17  ;;  %p421_p1 = scmp.lt.s32.totalorder %s308_s16, %s308_s16 }
  0x10   :  { %370 = vmatprep.subr.mxu1 %v126_v12  ;;  %p422_p2 = scmp.lt.s32.totalorder %s416_s17, %s416_s17 }
  0x11   :  { %355 = vmatmul.mubr.msk.bf16.vlgmr.msra.gmra.mxu0 %vm68_vm1, %v407_v10  ;;  %371 = vmatpush3.msra.mxu1 %v126_v12 }
  0x12   :  { %372 = vmatprep.subr.mxu1 %v125_v13  ;;  %p423_p3 = por %p422_p2, %p421_p1 }
  0x13   :  { %373 = vmatpush3.msra.mxu1 %v125_v13 }
  0x14   :  { %374 = vmatprep.subr.mxu1 %v124_v14  ;;  %p424_p4 = pnand %p423_p3, %p417_p0 }
  0x15   :  { %375 = vmatpush3.msra.mxu1 %v124_v14 }
  0x16   :  { %376 = vmatprep.subr.mxu1 %v123_v15 }
  0x17   :  { %377 = vmatpush3.msra.mxu1 %v123_v15 }
  0x18   :  { %378 = vmatprep.subr.mxu1 %v122_v16 }
  0x19   :  { %379 = vmatpush3.msra.mxu1 %v122_v16 }
  0x1a   :  { %380 = vmatprep.subr.mxu1 %v121_v17 }
  0x1b   :  { %381 = vmatpush3.msra.mxu1 %v121_v17 }
  0x1c   :  { %382 = vmatprep.subr.mxu1 %v120_v18 }
  0x1d   :  { %383 = vmatpush3.msra.mxu1 %v120_v18 }
  0x1e   :  { %384 = vmatprep.subr.mxu1 %v119_v19 }
  0x1f   :  { %385 = vmatpush3.msra.mxu1 %v119_v19 }
  0x20   :  { %386 = vmatprep.subr.mxu1 %v118_v20 }
  0x21   :  { %387 = vmatpush3.msra.mxu1 %v118_v20 }
  0x22   :  { %388 = vmatprep.subr.mxu1 %v117_v21 }
  0x23   :  { %389 = vmatpush3.msra.mxu1 %v117_v21 }
  0xd1   :  { %v106_v23 = vpop.f32.mrf.mxu0 }
  0xd2   :  { %v107_v24 = vadd.f32 %v315_v22, %v106_v23 }
  0xd3   :  { %v356_v25 = vpop.f32.mrf.mxu0 }
  0xd4   :  { %v113_v26 = vmax.f32 %v107_v24, 0.0 }
  0xd5   :  { %v109_v27 = vpop.f32.mrf.mxu0 }
  0xd6   :  { %v110_v28 = vadd.f32 %v315_v22, %v109_v27  ;;  %v115_v29 = vmul.f32 %v113_v26, %v113_v26 }
  0xd7   :  { %v357_v30 = vpop.f32.mrf.mxu0 }
  0xd8   :  { %v114_v31 = vmax.f32 %v110_v28, 0.0  ;;  %390 = vmatprep.mubr.f32.mxu1 %v115_v29 }
  0xda   :  { %v116_v32 = vmul.f32 %v114_v31, %v114_v31 }
  0xdc   :  { %391 = vmatmul.mubr.f32.vlgmr.msra.gmra.mxu1 %v116_v32 }
 0x19c   :  { %v392_v33 = vpop.f32.mrf.mxu1 }
 0x19d   :  { %v212_v37 = vadd.f32 %v392_v33, %v322_v34 }
 0x19e   :  { %v206_v35 = vpop.f32.mrf.mxu1 }
 0x19f   :  { %v207_v36 = vadd.f32 %v322_v34, %v206_v35  ;;  %v219_v39 = vsel %vm215_vm2, %v212_v37, -inf }
 0x1a1   :  { %v216_v38 = vsel %vm215_vm2, %v207_v36, -inf }
 0x1a2   :  { %217 = vmax.xlane.f32.xlu0 %v216_v38 }
 0x1a6   :  { %220 = vmax.xlane.f32.xlu0 %v219_v39 }
 0x22b   :  { %v218_v40 = vpop.xlane.xlu0 %217 }
 0x22c   :  { %v222_v41 = vsub.f32 %v207_v36, %v218_v40 }
 0x22e   :  { %v224_v42 = vmul.f32 1.442695, %v222_v41 }
 0x22f   :  { %v221_v43 = vpop.xlane.xlu0 %220 }
 0x230   :  { %408 = vpow2.f32 %v224_v42  ;;  %v223_v44 = vsub.f32 %v212_v37, %v221_v43 }
 0x232   :  { %v226_v45 = vmul.f32 1.442695, %v223_v44 }
 0x234   :  { %410 = vpow2.f32 %v226_v45 }
 0x23d   :  { %v409_v46 = vpop.eup %408 }
 0x23e   :  { %v228_v47 = vsel %vm215_vm2, %v409_v46, 0.0 }
 0x23f   :  { %229 = vadd.xlane.f32.xlu1 %v228_v47 }
 0x241   :  { %v411_v48 = vpop.eup %410 }
 0x242   :  { %v231_v49 = vsel %vm215_vm2, %v411_v48, 0.0 }
 0x243   :  { %232 = vadd.xlane.f32.xlu1 %v231_v49 }
 0x2c8   :  { %v230_v50 = vpop.xlane.xlu1 %229 }
 0x2c9   :  { %412 = vlog2.f32 %v230_v50 }
 0x2cc   :  { %v233_v51 = vpop.xlane.xlu1 %232 }
 0x2cd   :  { %414 = vlog2.f32 %v233_v51 }
 0x2d6   :  { %v413_v52 = vpop.eup %412 }
 0x2d7   :  { %v235_v53 = vmul.f32 0.6931472, %v413_v52 }
 0x2d9   :  { %v238_v54 = vsub.f32 %v222_v41, %v235_v53 }
 0x2da   :  { %v415_v55 = vpop.eup %414 }
 0x2db   :  { %240 = vst.msk [vmem:[#allocation2] sm:$0xff] %vm215_vm2, %v238_v54  ;;  %v237_v56 = vmul.f32 0.6931472, %v415_v55 }
 0x2dd   :  { %v239_v57 = vsub.f32 %v223_v44, %v237_v56 }
 0x2df   :  { %241 = vst.msk [vmem:[#allocation2 + $0x8] sm:$0xff] %vm215_vm2, %v239_v57 }
 0x2e6   :  { %v254_v58 = vld [vmem:[#allocation2 + $0x2] ss:$8 sm:$0x3]  ;;  %v246_v59 = vld [vmem:[#allocation2 + $0x1] ss:$8 sm:$0x3] }
 0x2e7   :  { %256 = vrot.lane.b32.xlu1 %v254_v58, %s440_s2  ;;  %248 = vrot.lane.b32.xlu0 %v246_v59, %s441_s4  ;;  %v242_v60 = vld [vmem:[#allocation2] ss:$8 sm:$0x3]  ;;  %v262_v61 = vld [vmem:[#allocation2 + $0x3] ss:$8 sm:$0x3] }
 0x2e8   :  { %v278_v62 = vld [vmem:[#allocation2 + $0x5] ss:$8 sm:$0x3]  ;;  %244 = vst.msk [vmem:[#allocation3] sm:$0x3] %vm243_vm3, %v242_v60 }
 0x2e9   :  { %v270_v63 = vld [vmem:[#allocation2 + $0x4] ss:$8 sm:$0x3]  ;;  %v294_v0 = vld [vmem:[#allocation2 + $0x7] ss:$8 sm:$0x3] }
 0x2ea   :  { %v286_v1 = vld [vmem:[#allocation2 + $0x6] ss:$8 sm:$0x3] }
 0x2eb   :  { %264 = vrot.lane.b32.xlu1 %v262_v61, %s442_s11  ;;  %280 = vrot.lane.b32.xlu0 %v278_v62, %s443_s12 }
 0x2ef   :  { %272 = vrot.lane.b32.xlu1 %v270_v63, %s444_s13  ;;  %296 = vrot.lane.b32.xlu0 %v294_v0, %s445_s14 }
 0x2f3   :  { %288 = vrot.lane.b32.xlu1 %v286_v1, %s446_s1 }
 0x359   :  { %v257_v2 = vpop.permute.xlu1 %256  ;;  %v249_v3 = vpop.permute.xlu0 %248 }
 0x35a   :  { %252 = vst.msk [vmem:[#allocation3] sm:$0x3] %vm251_vm4, %v249_v3 }
 0x35b   :  { %260 = vst.msk [vmem:[#allocation3] sm:$0x3] %vm259_vm5, %v257_v2 }
 0x35d   :  { %v265_v4 = vpop.permute.xlu1 %264  ;;  %v281_v5 = vpop.permute.xlu0 %280 }
 0x35e   :  { %268 = vst.msk [vmem:[#allocation3] sm:$0x3] %vm267_vm6, %v265_v4 }
 0x361   :  { %v273_v6 = vpop.permute.xlu1 %272  ;;  %v297_v8 = vpop.permute.xlu0 %296 }
 0x362   :  { %276 = vst.msk [vmem:[#allocation3] sm:$0x3] %vm275_vm7, %v273_v6 }
 0x363   :  { %284 = vst.msk [vmem:[#allocation3] sm:$0x3] %vm283_vm8, %v281_v5 }
 0x365   :  { %v289_v7 = vpop.permute.xlu1 %288 }
 0x366   :  { %292 = vst.msk [vmem:[#allocation3] sm:$0x3] %vm291_vm9, %v289_v7 }
 0x367   :  { %300 = vst.msk [vmem:[#allocation3] sm:$0x3] %vm299_vm10, %v297_v8 }
 0x368   :  { %427 = shalt.err (!%p424_p4)
}
 0x369   :  { %310 = dma.vmem_to_hbm [thread:$0]  %s308_s16, 32, %s561_s5, [#allocation4]  }
 0x36a   :  { %436 = dma.done.wait [#allocation4], 32  }
 0x36b   :  { %437 = vsyncadd [#allocation4], 4294967264 }
 0x36c   :  { %314 = vsyncpa [#allocation4], 1 }

</bundles_post_ra>
